<compile_context>
chip_gen: v7x
topology: tpu7x:2x2x1
jax: 0.10.0
libtpu: 0.0.40
codegen_flags: <defaults>
</compile_context>

<pallas_src>
import jax
import jax.numpy as jnp
from jax.experimental import pallas as pl
from jax.experimental.pallas import tpu as pltpu


def _is_v5_device():
    try:
        kind = jax.devices()[0].device_kind.lower()
        return "v5" in kind
    except Exception:
        return True  # conservative: fall back to the f32 compute path


def _compute_dtype_for(dtype):
    """Native bf16/f16 compute on v6e/v7x; f32 upcast on v5e (no bf16 VPU/EUP)."""
    if dtype in (jnp.bfloat16, jnp.float16):
        return jnp.float32 if _is_v5_device() else dtype
    return jnp.float32


def _make_kernel(compute_dtype):
    def kernel(x_ref, o_ref):
        x = x_ref[...].astype(compute_dtype)
        # Forward of TanhLeakyRelu: max(tanh(x), x)
        o_ref[...] = jnp.maximum(jnp.tanh(x), x).astype(o_ref.dtype)

    return kernel


def tanh_leaky_relu(x, *, max_block_rows=1024):
    """Elementwise max(tanh(x), x) for an arbitrary-shaped array."""
    orig_shape = x.shape
    dtype = x.dtype
    size = int(x.size)

    if size == 0:
        return x

    # Lane-dense layout: 512 lanes for non-tiny inputs, 128 otherwise (limits padding).
    lanes = 512 if size >= 512 * 8 else 128
    rows = pl.cdiv(size, lanes)
    padded_size = rows * lanes

    x_flat = jnp.ravel(x)
    if padded_size != size:
        # Pad only to a multiple of `lanes` (< lanes extra elements); zero-pad is
        # semantically safe since padded elements are sliced off afterwards.
        x_flat = jnp.pad(x_flat, (0, padded_size - size))
    x2d = x_flat.reshape(rows, lanes)

    # Block rows: aim for >= 4 grid steps (v7x 2-TC sharding + DMA pipelining),
    # keep blocks a multiple of 8 sublanes, cap at max_block_rows (~2 MiB f32).
    if rows <= 8:
        block_rows = rows                      # full extent; (8,128) rule waived
    else:
        target = pl.cdiv(rows, 4)
        block_rows = min(max_block_rows, ((target + 7) // 8) * 8)
        block_rows = max(block_rows, 8)

    grid = (pl.cdiv(rows, block_rows),)
    itemsize = jnp.dtype(dtype).itemsize

    out2d = pl.pallas_call(
        _make_kernel(_compute_dtype_for(dtype)),
        out_shape=jax.ShapeDtypeStruct((rows, lanes), dtype),
        grid_spec=pltpu.PrefetchScalarGridSpec(
            num_scalar_prefetch=0,
            grid=grid,
            in_specs=[pl.BlockSpec((block_rows, lanes), lambda i: (i, 0))],
            out_specs=pl.BlockSpec((block_rows, lanes), lambda i: (i, 0)),
        ),
        compiler_params=pltpu.CompilerParams(
            dimension_semantics=("parallel",),  # independent blocks; v7x 2-TC shard
        ),
        cost_estimate=pl.CostEstimate(
            flops=padded_size,                      # one max per element
            transcendentals=padded_size,            # one tanh per element
            bytes_accessed=2 * padded_size * itemsize,
        ),
    )(x2d)

    out_flat = out2d.reshape(-1)
    if padded_size != size:
        out_flat = out_flat[:size]
    return out_flat.reshape(orig_shape)


if __name__ == "__main__":
    key = jax.random.PRNGKey(0)

    # Small shape consistent with the module's elementwise forward.
    N, C, H, W = 2, 4, 16, 16
    x = jax.random.normal(key, (N, C, H, W), jnp.float32) * 3.0

    out = tanh_leaky_relu(x)
    out = jax.block_until_ready(out)

    # Pure-JAX reference.
    ref = jnp.maximum(jnp.tanh(x), x)

    assert out.shape == x.shape
    assert jnp.allclose(out, ref, atol=1e-5, rtol=1e-5), float(jnp.max(jnp.abs(out - ref)))
    print("KERNEL_OK")
</pallas_src>

<mosaic_0001>
module attributes {stable_mosaic.version = 11 : i64} {
  func.func @kernel(%arg0: i32, %arg1: memref<8x128xf32, #tpu.memory_space<vmem>>, %arg2: memref<8x128xf32, #tpu.memory_space<vmem>>) attributes {dimension_semantics = [#tpu.dimension_semantics<parallel>], iteration_bounds = array<i64: 2>, scalar_prefetch = 0 : i64, scratch_operands = 0 : i64, tpu.core_type = #tpu.core_type<tc>, window_params = [{transform_indices = @transform_0, window_bounds = array<i64: 8, 128>}, {transform_indices = @transform_1, window_bounds = array<i64: 8, 128>}]} {
    %c0 = arith.constant 0 : index
    %c0_0 = arith.constant 0 : index
    %0 = vector.load %arg1[%c0, %c0_0] : memref<8x128xf32, #tpu.memory_space<vmem>>, vector<8x128xf32>
    %1 = math.tanh %0 : vector<8x128xf32>
    %2 = arith.maximumf %1, %0 : vector<8x128xf32>
    %c0_1 = arith.constant 0 : index
    %c0_2 = arith.constant 0 : index
    %3 = vector.load %arg2[%c0_1, %c0_2] : memref<8x128xf32, #tpu.memory_space<vmem>>, vector<8x128xf32>
    tpu.vector_store %arg2[%c0_1, %c0_2], %2 {strides = array<i32>} : memref<8x128xf32, #tpu.memory_space<vmem>>, vector<8x128xf32>,
    return
  }
  func.func @transform_0(%arg0: i32) -> (i32, i32) {
    %c0_i32 = arith.constant 0 : i32
    %c0_i32_0 = arith.constant 0 : i32
    return %arg0, %c0_i32 : i32, i32
  }
  func.func @transform_1(%arg0: i32) -> (i32, i32) {
    %c0_i32 = arith.constant 0 : i32
    %c0_i32_0 = arith.constant 0 : i32
    return %arg0, %c0_i32 : i32, i32
  }
}

</mosaic_0001>

<bundles_post_ra>
// kernel: tpu_custom_call.1
= control target key start
LH: loop header
LB: loop body
LE: loop exit
PB: predicated region body
PF: predicated region fallthrough
CT: control target
= control target key end

     0   :  { %6 = vsyncpa [#allocation3], 0  ;;  %s551_s0 = inlined_call_operand.hbm [shape: f32[16,128], index: 0, kind: input, shape index: {}]   ;;  %s552_s1 = inlined_call_operand.hbm [shape: f32[16,128], index: 1, kind: output, shape index: {}]  }
   0x1   :  { %8 = vsyncpa [#allocation3 + $0x1], 0 }
   0x2   :  { %9 = vsyncpa [#allocation4], 0 }
   0x3   :  { %11 = vsyncpa [#allocation4 + $0x1], 0  ;;  %s390_s6 = smov 0   ;;  %s392_s7 = smov 0  }
   0x4   :  { %s394_s8 = smov 0   ;;  %s396_s9 = smov 0  }
   0x5 LB: > { %s411_s10 = sadd.s32 4294967295, %s376_s9   ;;  %s220_s11 = sadd.s32 4294967294, %s376_s9   ;;  %s376_s9 = sphi %s396_s9, %s567_s9   ;;  %s372_s8 = sphi %s394_s8, %s566_s8   ;;  %s368_s7 = sphi %s392_s7, %s565_s7   ;;  %s364_s6 = sphi %s390_s6, %s564_s6  }
   0x6   : > { %s415_s12 = sadd.s32 1, %s376_s9   ;;  %s24_s13 = sadd.s32 1, %s372_s8 }
   0x7   : > { %s21_s14 = ssub.s32 %s376_s9, %s415_s12  ;;  %p31_p0 = scmp.ne.s32.totalorder %s372_s8, %s368_s7 }
   0x8   : > { %p22_p1 = scmp.eq.s32.totalorder %s21_s14, 0  ;;  %p32_p2 = scmp.eq.s32.totalorder %s376_s9, 0 }
   0x9   : > { %p37_p3 = scmp.ne.s32.totalorder %s368_s7, %s364_s6  ;;  %p38_p4 = scmp.eq.s32.totalorder %s411_s10, 0 }
   0xa   : > { %s427_s15 = scalar_select %p22_p1, %s372_s8, %s24_s13  }
   0xb   : > { %p429_p5 = por %p32_p2, %p31_p0  ;;  %p433_p6 = por %p38_p4, %p37_p3 }
   0xc   : > { %p61_p7 = scmp.eq.s32.totalorder %s411_s10, 1  ;;  %p67_p8 = scmp.eq.s32.totalorder %s220_s11, 1 }
   0xd   : > { %p244_p10 = scmp.lt.s32.totalorder %s376_s9, 2  ;;  %s87_s20 = sand.u32 1, %s372_s8  }
   0xe   : > { %p440_p11 = por %p61_p7, %p31_p0  ;;  %p444_p12 = por %p67_p8, %p37_p3 }
   0xf   : > { %s224_s21 = sshll.u32 %s376_s9, 7  ;;  %s223_s22 = sshll.u32 %s87_s20, 3 }
  0x10   : > { %s556_s18 = scalar_select %p440_p11, 1, 0 }
  0x11   : > { %s557_s19 = scalar_select %p444_p12, 1, 0 }
  0x12   : > { %s453_s25 = scalar_lea.hbm %s551_s0, %s224_s21  ;;  %s91_s26 = scalar_lea.vmem [#allocation2], %s223_s22 }
  0x13   : > { %s98_s27 = sshll.u32 %s91_s26, 4  ;;  %p457_p13 = pnand %p244_p10, %p429_p5  ;;  %s461_s27 = int_to_ptr.vmem [resolvable:$true] %s98_s27 }
  0x14   : > { %s88_s29 = scalar_lea.sflag [#allocation3], %s87_s20  ;;  %s280_s30 = scalar_lea.hbm %s453_s25, 128 }
  0x15   : > { %p281_p2 = scmp.ne.s32.totalorder %s453_s25, %s280_s30  ;;  %p282_p3 = pneg %p457_p13 }
  0x16   : > { %s285_s4 = scalar_lea.hbm %s551_s0, 256  ;;  %p286_p5 = scmp.lt.u32.totalorder %s453_s25, %s551_s0 }
  0x17   : > { %p283_p4 = pnand %p282_p3, %p281_p2  ;;  %p287_p8 = scmp.lt.u32.totalorder %s285_s4, %s280_s30 }
  0x18   : > { %p289_p9 = scmp.lt.u32.totalorder %s280_s30, %s453_s25 }
  0x19   : > { %p284_p7 = pneg %p283_p4  ;;  %p288_p10 = por %p287_p8, %p286_p5 }
  0x1b   : > { %p290_p0 = por %p289_p9, %p288_p10 }
  0x1d   : > { %p291_p1 = pnand %p290_p0, %p284_p7 }
  0x1f   : > { %294 = shalt.err (!%p291_p1)
}
  0x20   : > { %s295_s13 = scalar_lea.vmem %s461_s27, 128  ;;  %s378_s14 = smov [#allocation2]  }
  0x21   : > { %p296_p2 = scmp.ne.s32.totalorder %s461_s27, %s295_s13  ;;  %s300_s16 = sshll.u32 %s378_s14, 4  ;;  %s301_s16 = int_to_ptr.vmem [resolvable:$false] %s300_s16 }
  0x22   : > { %s302_s20 = scalar_lea.vmem %s301_s16, 256  ;;  %p303_p11 = scmp.lt.s32.totalorder %s461_s27, %s301_s16 }
  0x23   : > { %p298_p4 = pnand %p296_p2, %p282_p3  ;;  %p304_p5 = scmp.lt.s32.totalorder %s302_s20, %s295_s13 }
  0x25   : > { %p299_p12 = pneg %p298_p4  ;;  %p305_p8 = por %p304_p5, %p303_p11 }
  0x27   : > { %p306_p9 = pnand %p305_p8, %p299_p12 }
  0x29   : > { %309 = shalt.err (!%p306_p9)
}
  0x2a   : > { %239 = dma.hbm_to_vmem [thread:$0]  (!%p457_p13), %s453_s25, 128, %s461_s27, %s88_s29  }
  0x2b   : > { %p559_p0 = scmp.lt.s32.totalorder %s376_s9, 3  ;;  %p560_p1 = scmp.ge.s32.totalorder %s376_s9, 1 }
  0x2d   : > { %p104_p3 = pnand %p560_p1, %p559_p0 }
  0x2e   : > { %s495_s21 = sand.u32 (!%p104_p3), 1, %s368_s7  }
  0x2f   : > { %107 = sbr.rel (%p104_p3) target bundleno = 83 (0x53), region = 24  ;;  %s226_s22 = sshll.u32 (!%p104_p3), %s495_s21, 3 }
  0x30   : > { %s110_s23 = scalar_lea.sflag (!%p104_p3), [#allocation3], %s495_s21  ;;  %s113_s24 = scalar_lea.vmem (!%p104_p3), [#allocation2], %s226_s22 }
  0x36   : > { %355 = dma.done.wait (%p433_p6), %s110_s23, 128  }
  0x37   : > { %357 = vsyncadd (%p433_p6), %s110_s23, 4294967168  ;;  %v132_v0 = vld [vmem:[%s113_s24] sm:$0xff]  ;;  %s131_s25 = scalar_lea.vmem [#allocation5], %s226_s22  ;;  %s229_s27 = sshll.u32 %s411_s10, 7 }
  0x38   : > { %278 = vtanh.f32 %v132_v0  ;;  %s150_s26 = sshll.u32 %s131_s25, 4  ;;  %s509_s17 = scalar_lea.hbm %s552_s1, %s229_s27  ;;  %s504_s26 = int_to_ptr.vmem [resolvable:$true] %s150_s26 }
  0x39   : > { %s137_s30 = scalar_lea.sflag [#allocation4], %s495_s21  ;;  %s310_s2 = scalar_lea.vmem %s504_s26, 128 }
  0x3a   : > { %p311_p6 = scmp.ne.s32.totalorder %s504_s26, %s310_s2  ;;  %p561_p11 = scmp.ne.s32.totalorder %s556_s18, 0 }
  0x3b   : > { %s379_s10 = smov [#allocation5]  }
  0x3c   : > { %p312_p12 = pnand %p311_p6, %p561_p11  ;;  %s314_s3 = sshll.u32 %s379_s10, 4  ;;  %s315_s3 = int_to_ptr.vmem [resolvable:$false] %s314_s3 }
  0x3d   : > { %s316_s4 = scalar_lea.vmem %s315_s3, 256  ;;  %p317_p7 = scmp.lt.s32.totalorder %s504_s26, %s315_s3 }
  0x3e   : > { %p313_p13 = pneg %p312_p12  ;;  %p318_p10 = scmp.lt.s32.totalorder %s316_s4, %s310_s2 }
  0x40   : > { %p319_p2 = por %p318_p10, %p317_p7 }
  0x42   : > { %v279_v1 = vpop.eup %278  ;;  %p320_p4 = pnand %p319_p2, %p313_p13 }
  0x43   : > { %v134_v2 = vmax.f32 %v279_v1, %v132_v0 }
  0x45   : > { %135 = vst [vmem:[%s131_s25] sm:$0xff] %v134_v2 }
  0x46   : > { %323 = shalt.err (!%p320_p4)
}
  0x47   : > { %s324_s5 = scalar_lea.hbm %s509_s17, 128  ;;  %s328_s14 = scalar_lea.hbm %s552_s1, 256 }
  0x48   : > { %p325_p5 = scmp.ne.s32.totalorder %s509_s17, %s324_s5  ;;  %p329_p0 = scmp.lt.u32.totalorder %s509_s17, %s552_s1 }
  0x49   : > { %p330_p1 = scmp.lt.u32.totalorder %s328_s14, %s324_s5  ;;  %p332_p6 = scmp.lt.u32.totalorder %s324_s5, %s509_s17 }
  0x4a   : > { %p326_p8 = pnand %p325_p5, %p561_p11 }
  0x4b   : > { %p331_p3 = por %p330_p1, %p329_p0 }
  0x4c   : > { %p327_p9 = pneg %p326_p8 }
  0x4d   : > { %p333_p12 = por %p332_p6, %p331_p3 }
  0x4f   : > { %p334_p13 = pnand %p333_p12, %p327_p9 }
  0x51   : > { %337 = shalt.err (!%p334_p13)
}
  0x52   : > { %234 = dma.vmem_to_hbm [thread:$0]  (%p561_p11), %s504_s26, 128, %s509_s17, %s137_s30  }
  0x53 PF: > { %s162_s21 = sand.u32 1, %s364_s6   ;;  %p562_p7 = scmp.ne.s32.totalorder %s557_s19, 0 }
  0x54   : > { %p563_p10 = scmp.ge.s32.totalorder %s376_s9, 2  ;;  %s163_s22 = scalar_lea.sflag [#allocation4], %s162_s21 }
  0x56   : > { %p241_p2 = pnand %p563_p10, %p562_p7 }
  0x58   : > { %359 = dma.done.wait (!%p241_p2), %s163_s22, 128  }
  0x59   : > { %361 = vsyncadd (!%p241_p2), %s163_s22, 4294967168  ;;  %p14_p4 = scmp.ge.s32.totalorder %s415_s12, 4   ;;  %s564_s6 = smov %s368_s7 }
  0x5a   : > { %s565_s7 = smov %s372_s8  ;;  %s566_s8 = smov %s427_s15 }
  0x5b   : > { %s567_s9 = smov %s415_s12  ;;  %16 = sbr.rel (!%p14_p4) target bundleno = 5 (0x5), region = 69 }
  0x62   :  { %168 = vsyncpa [#allocation3], 1 }
  0x63   :  { %170 = vsyncpa [#allocation3 + $0x1], 1 }
  0x64   :  { %171 = vsyncpa [#allocation4], 1 }
  0x65   :  { %173 = vsyncpa [#allocation4 + $0x1], 1 }

</bundles_post_ra>
